<compile_context>
chip_gen: v7x
topology: tpu7x:2x2x1
jax: 0.10.0
libtpu: 0.0.40
codegen_flags: <defaults>
</compile_context>

<pallas_src>
import functools
import math

import jax
import jax.numpy as jnp
from jax.experimental import pallas as pl
from jax.experimental.pallas import tpu as pltpu


def _round_up(x, m):
    return (x + m - 1) // m * m


def _pick_tile(dim, candidates):
    """First candidate that evenly divides `dim`, else the full dim (always legal)."""
    for t in candidates:
        if dim % t == 0:
            return t
    return dim


@functools.lru_cache(maxsize=None)
def _vmem_limit():
    """Generation-aware scoped-VMEM budget: ~3/4 of physical, capped at 100 MiB.

    v5e/v6e (128 MiB physical) -> 96 MiB; v7x (64 MiB physical) -> 48 MiB.
    Conservative 48 MiB fallback if the query is unavailable.
    """
    try:
        cap = pltpu.get_tpu_info().vmem_capacity_bytes
    except Exception:
        cap = 64 * 1024 * 1024
    return int(min(cap * 3 // 4, 100 * 1024 * 1024))


# ---------------------------------------------------------------------------
# Kernel 1: qkv linear, output laid out directly as (3, B, N, C) (lane-dense).
# ---------------------------------------------------------------------------
def _qkv_kernel_noacc(x_ref, w_ref, o_ref):
    # Single K step: no accumulator round-trip, no pl.when branches.
    o_ref[0, 0] = jnp.dot(x_ref[0], w_ref[0],
                          preferred_element_type=jnp.float32).astype(o_ref.dtype)


def _qkv_kernel_acc(x_ref, w_ref, o_ref, acc_ref):
    kk = pl.program_id(2)

    @pl.when(kk == 0)
    def _():
        acc_ref[...] = jnp.zeros_like(acc_ref)

    acc_ref[...] += jnp.dot(x_ref[0], w_ref[0],
                            preferred_element_type=jnp.float32)

    @pl.when(kk == pl.num_programs(2) - 1)
    def _():
        o_ref[0, 0] = acc_ref[...].astype(o_ref.dtype)


def pallas_qkv(x, w3):
    """x: (B, N, C); w3: (3, C, C) repacked qkv weight -> (3, B, N, C).

    Each grid step produces a full lane-dense (N, C) slab (C is a multiple of 128
    for real ViTs, or the full array dim otherwise), so HBM writebacks are unmasked
    and the MXU output width is maximal. With a single K tile (the common ViT case,
    C <= 2048) the x[b] block also stays resident across the three q/k/v steps.
    """
    B, N, C = x.shape
    three, C2, C3 = w3.shape
    assert three == 3 and C2 == C and C3 == C

    tk = C if C <= 2048 else _pick_tile(C, (1024, 512, 256))
    kt = C // tk
    grid = (B, 3, kt)

    kernel = _qkv_kernel_noacc if kt == 1 else _qkv_kernel_acc
    scratch = [] if kt == 1 else [pltpu.VMEM((N, C), jnp.float32)]

    return pl.pallas_call(
        kernel,
        out_shape=jax.ShapeDtypeStruct((3, B, N, C), x.dtype),
        grid_spec=pltpu.PrefetchScalarGridSpec(
            num_scalar_prefetch=0,
            grid=grid,
            in_specs=[
                pl.BlockSpec((1, N, tk), lambda b, p, kk: (b, 0, kk)),
                pl.BlockSpec((1, tk, C), lambda b, p, kk: (p, kk, 0)),
            ],
            out_specs=pl.BlockSpec((1, 1, N, C),
                                   lambda b, p, kk: (p, b, 0, 0)),
            scratch_shapes=scratch,
        ),
        compiler_params=pltpu.CompilerParams(
            dimension_semantics=("parallel", "parallel", "arbitrary"),
            vmem_limit_bytes=_vmem_limit(),
        ),
    )(x, w3)


# ---------------------------------------------------------------------------
# Kernel 2: scaled-dot-product attention over (batch, head-group) grid.
# ---------------------------------------------------------------------------
def _head_group_lanes(C, D):
    """Lane width of one head group: a multiple of both D and 128 (legal, lane-dense
    BlockSpec lane-blocking) that divides C, targeting ~256 lanes; else full C."""
    if C <= 512 or C % 128 != 0:
        return C
    base = (D * 128) // math.gcd(D, 128)          # lcm(D, 128)
    if C % base != 0:
        return C
    gd = base
    while gd < 256 and C % (gd * 2) == 0:
        gd *= 2
    return gd


def _attn_kernel(qkv_ref, o_ref, *, scale, group_heads):
    """One head group of one batch element; lane-dense (N, G*D) in and out."""
    # TODO(synk): for N >~ 1-2k, replace the materialized (G, N, N) score block with
    # a flash-style online softmax over a KV grid axis (tq/tk ~ 128-256) — required
    # on v7x (64 MiB VMEM) for long sequences.
    q = qkv_ref[0, 0] * scale            # (N, GD); fold scale into q (N*D mults)
    k = qkv_ref[1, 0]                    # (N, GD)
    v = qkv_ref[2, 0]                    # (N, GD)
    n, gd = q.shape
    d = gd // group_heads

    # Single relayout (XLU) per operand instead of per-head slicing/concats.
    q = jnp.swapaxes(q.reshape(n, group_heads, d), 0, 1)   # (G, N, D)
    k = jnp.swapaxes(k.reshape(n, group_heads, d), 0, 1)
    v = jnp.swapaxes(v.reshape(n, group_heads, d), 0, 1)

    s = jnp.einsum("hnd,hmd->hnm", q, k,
                   preferred_element_type=jnp.float32)     # (G, N, N) f32
    s = s - jnp.max(s, axis=-1, keepdims=True)
    p = jnp.exp(s)
    l = jnp.sum(p, axis=-1, keepdims=True)                 # (G, N, 1)
    inv = pl.reciprocal(l, approx=True)                    # EUP (otherwise idle)
    inv = inv * (2.0 - l * inv)                            # one Newton step: near-exact
    p = p * inv

    o = jnp.einsum("hnm,hmd->hnd", p.astype(v.dtype), v,
                   preferred_element_type=jnp.float32)     # (G, N, D)

    # (G, N, D) -> (N, G*D): one fused relayout, lane-dense writeback.
    o_ref[0] = jnp.swapaxes(o, 0, 1).reshape(n, gd).astype(o_ref.dtype)


def pallas_attention(qkv, scale, num_heads):
    """qkv: (3, B, N, C) -> (B, N, C). Grid over (batch, head-groups)."""
    _, B, N, C = qkv.shape
    assert C % num_heads == 0
    D = C // num_heads
    GD = _head_group_lanes(C, D)
    G = GD // D
    n_groups = C // GD

    return pl.pallas_call(
        functools.partial(_attn_kernel, scale=scale, group_heads=G),
        out_shape=jax.ShapeDtypeStruct((B, N, C), qkv.dtype),
        grid=(B, n_groups),
        in_specs=[pl.BlockSpec((3, 1, N, GD), lambda b, g: (0, b, 0, g))],
        out_specs=pl.BlockSpec((1, N, GD), lambda b, g: (b, 0, g)),
        compiler_params=pltpu.CompilerParams(
            dimension_semantics=("parallel", "parallel"),
            vmem_limit_bytes=_vmem_limit(),
        ),
    )(qkv)


# ---------------------------------------------------------------------------
# Kernel 3: tiled, pipelined linear (+bias).
# ---------------------------------------------------------------------------
def _linear_kernel_noacc(x_ref, w_ref, b_ref, o_ref):
    o_ref[...] = (jnp.dot(x_ref[...], w_ref[...],
                          preferred_element_type=jnp.float32)
                  + b_ref[...].astype(jnp.float32)).astype(o_ref.dtype)


def _linear_kernel_acc(x_ref, w_ref, b_ref, o_ref, acc_ref):
    kk = pl.program_id(2)

    @pl.when(kk == 0)
    def _():
        acc_ref[...] = jnp.zeros_like(acc_ref)

    acc_ref[...] += jnp.dot(x_ref[...], w_ref[...],
                            preferred_element_type=jnp.float32)

    @pl.when(kk == pl.num_programs(2) - 1)
    def _():
        o_ref[...] = (acc_ref[...] + b_ref[...].astype(jnp.float32)
                      ).astype(o_ref.dtype)


def pallas_linear_bias(x, w, b):
    """y = x @ w + b, tiled over (M//tm, N//tn, K//tk) with the reduction axis last."""
    M, K = x.shape
    K2, Nout = w.shape
    assert K2 == K
    M_orig = M

    tm = _pick_tile(M, (256, 128))
    if tm == M and M > 1024:
        # ViT rows (B*197) are rarely 128-divisible: pad instead of one huge block
        # that would serialize the M axis and blow the v7x VMEM budget.
        Mp = _round_up(M, 256)
        x = jnp.pad(x, ((0, Mp - M), (0, 0)))
        M, tm = Mp, 256

    tn = _pick_tile(Nout, (512, 384, 256, 128))
    tk = K if K <= 2048 else _pick_tile(K, (1024, 512, 384, 256, 128))
    kt = K // tk
    grid = (M // tm, Nout // tn, kt)
    b2 = b.reshape(1, Nout)

    kernel = _linear_kernel_noacc if kt == 1 else _linear_kernel_acc
    scratch = [] if kt == 1 else [pltpu.VMEM((tm, tn), jnp.float32)]

    out = pl.pallas_call(
        kernel,
        out_shape=jax.ShapeDtypeStruct((M, Nout), x.dtype),
        grid_spec=pltpu.PrefetchScalarGridSpec(
            num_scalar_prefetch=0,
            grid=grid,
            in_specs=[
                pl.BlockSpec((tm, tk), lambda i, j, kk: (i, kk)),
                pl.BlockSpec((tk, tn), lambda i, j, kk: (kk, j)),
                pl.BlockSpec((1, tn), lambda i, j, kk: (0, j)),
            ],
            out_specs=pl.BlockSpec((tm, tn), lambda i, j, kk: (i, j)),
            scratch_shapes=scratch,
        ),
        compiler_params=pltpu.CompilerParams(
            dimension_semantics=("parallel", "parallel", "arbitrary"),
            vmem_limit_bytes=_vmem_limit(),
        ),
    )(x, w, b2)
    return out[:M_orig] if M_orig != M else out


# ---------------------------------------------------------------------------
# Full Attention forward (matches the nn.Module semantics, qkv_bias=False).
# ---------------------------------------------------------------------------
def attention_forward(x, params, num_heads):
    B, N, C = x.shape
    assert C % num_heads == 0
    H = num_heads
    D = C // H
    scale = D ** (-0.5)

    # One-time weight repack: (C, 3C) -> (3, C, C) so each part is a contiguous
    # (C, C) slab. Weights only (tiny, amortized); activations are never transposed
    # at the XLA level.
    w3 = jnp.transpose(params["w_qkv"].reshape(C, 3, C), (1, 0, 2))

    qkv = pallas_qkv(x, w3)                      # (3, B, N, C), lane-dense
    y = pallas_attention(qkv, scale, H)          # (B, N, C), lane-dense
    out = pallas_linear_bias(y.reshape(B * N, C),  # free reshape
                             params["w_proj"], params["b_proj"])
    return out.reshape(B, N, C)


# Pure-JAX reference for verification.
def attention_reference(x, params, num_heads):
    B, N, C = x.shape
    head_dim = C // num_heads
    scale = head_dim ** (-0.5)
    qkv = x @ params["w_qkv"]
    qkv = qkv.reshape(B, N, 3, num_heads, head_dim)
    qkv = jnp.transpose(qkv, (2, 0, 3, 1, 4))
    q, k, v = qkv[0], qkv[1], qkv[2]
    attn = jnp.einsum("bhnd,bhmd->bhnm", q, k) * scale
    attn = jax.nn.softmax(attn, axis=-1)
    o = jnp.einsum("bhnm,bhmd->bhnd", attn, v)
    o = jnp.transpose(o, (0, 2, 1, 3)).reshape(B, N, C)
    return o @ params["w_proj"] + params["b_proj"]


if __name__ == "__main__":
    # Small shapes consistent with the module: B=2, N=8 patches, C=32 dim, 4 heads.
    B, N, C = 2, 8, 32
    num_heads = 4

    key = jax.random.PRNGKey(0)
    kx, kqkv, kpw, kpb = jax.random.split(key, 4)

    x = jax.random.normal(kx, (B, N, C), dtype=jnp.float32)

    # Parameters stored "input-major" (in_features, out_features) = W^T of
    # PyTorch nn.Linear.weight, so y = x @ W.
    params = {
        "w_qkv": jax.random.normal(kqkv, (C, 3 * C), dtype=jnp.float32) * 0.05,
        "w_proj": jax.random.normal(kpw, (C, C), dtype=jnp.float32) * 0.05,
        "b_proj": jax.random.normal(kpb, (C,), dtype=jnp.float32) * 0.02,
    }

    # f32 run: strict check against the pure-JAX reference.
    out = jax.block_until_ready(attention_forward(x, params, num_heads))
    ref = attention_reference(x, params, num_heads)
    assert out.shape == (B, N, C)
    assert jnp.allclose(out, ref, atol=5e-4, rtol=5e-4), "f32 mismatch vs reference"

    # bf16 run (production dtype: halves HBM traffic, doubles MXU throughput);
    # kernels keep f32 accumulators + f32 softmax stats internally.
    xb = x.astype(jnp.bfloat16)
    pb = {k: v.astype(jnp.bfloat16) for k, v in params.items()}
    out_bf = jax.block_until_ready(attention_forward(xb, pb, num_heads))
    ref_bf = attention_reference(
        xb.astype(jnp.float32),
        {k: v.astype(jnp.float32) for k, v in pb.items()},
        num_heads)
    assert out_bf.shape == (B, N, C)
    assert jnp.allclose(out_bf.astype(jnp.float32), ref_bf, atol=5e-2, rtol=5e-2), \
        "bf16 mismatch vs reference"

    print("KERNEL_OK")
</pallas_src>

<mosaic_0001>
module attributes {stable_mosaic.version = 11 : i64} {
  func.func @_qkv_kernel_noacc(%arg0: i32, %arg1: i32, %arg2: i32, %arg3: memref<1x8x32xf32, #tpu.memory_space<vmem>>, %arg4: memref<1x32x32xf32, #tpu.memory_space<vmem>>, %arg5: memref<1x1x8x32xf32, #tpu.memory_space<vmem>>) attributes {dimension_semantics = [#tpu.dimension_semantics<parallel>, #tpu.dimension_semantics<parallel>, #tpu.dimension_semantics<arbitrary>], iteration_bounds = array<i64: 2, 3, 1>, scalar_prefetch = 0 : i64, scratch_operands = 0 : i64, tpu.core_type = #tpu.core_type<tc>, window_params = [{transform_indices = @transform_0, window_bounds = array<i64: 1, 8, 32>}, {transform_indices = @transform_1, window_bounds = array<i64: 1, 32, 32>}, {transform_indices = @transform_2, window_bounds = array<i64: 1, 1, 8, 32>}]} {
    %c0 = arith.constant 0 : index
    %c0_0 = arith.constant 0 : index
    %c0_1 = arith.constant 0 : index
    %0 = vector.load %arg3[%c0, %c0_0, %c0_1] : memref<1x8x32xf32, #tpu.memory_space<vmem>>, vector<1x8x32xf32>
    %1 = vector.shape_cast %0 : vector<1x8x32xf32> to vector<8x32xf32>
    %c0_2 = arith.constant 0 : index
    %c0_3 = arith.constant 0 : index
    %c0_4 = arith.constant 0 : index
    %2 = vector.load %arg4[%c0_2, %c0_3, %c0_4] : memref<1x32x32xf32, #tpu.memory_space<vmem>>, vector<1x32x32xf32>
    %3 = vector.shape_cast %2 : vector<1x32x32xf32> to vector<32x32xf32>
    %cst = arith.constant dense<0.000000e+00> : vector<8x32xf32>
    %4 = tpu.matmul %1, %3, %cst {dimension_numbers = #tpu.dot_dimension_numbers<[1], [0], [0], [1], [0, 0, 1, 1], [], []>} : vector<8x32xf32>, vector<32x32xf32>, vector<8x32xf32> -> vector<8x32xf32>
    %c0_5 = arith.constant 0 : index
    %c0_6 = arith.constant 0 : index
    %c0_7 = arith.constant 0 : index
    %c0_8 = arith.constant 0 : index
    %5 = vector.load %arg5[%c0_5, %c0_6, %c0_7, %c0_8] : memref<1x1x8x32xf32, #tpu.memory_space<vmem>>, vector<1x1x8x32xf32>
    %6 = vector.shape_cast %5 : vector<1x1x8x32xf32> to vector<8x32xf32>
    %7 = vector.shape_cast %4 : vector<8x32xf32> to vector<1x1x8x32xf32>
    tpu.vector_store %arg5[%c0_5, %c0_6, %c0_7, %c0_8], %7 {strides = array<i32>} : memref<1x1x8x32xf32, #tpu.memory_space<vmem>>, vector<1x1x8x32xf32>,
    return
  }
  func.func @transform_0(%arg0: i32, %arg1: i32, %arg2: i32) -> (i32, i32, i32) {
    %c0_i32 = arith.constant 0 : i32
    %c0_i32_0 = arith.constant 0 : i32
    return %arg0, %c0_i32, %arg2 : i32, i32, i32
  }
  func.func @transform_1(%arg0: i32, %arg1: i32, %arg2: i32) -> (i32, i32, i32) {
    %c0_i32 = arith.constant 0 : i32
    %c0_i32_0 = arith.constant 0 : i32
    return %arg1, %arg2, %c0_i32 : i32, i32, i32
  }
  func.func @transform_2(%arg0: i32, %arg1: i32, %arg2: i32) -> (i32, i32, i32, i32) {
    %c0_i32 = arith.constant 0 : i32
    %c0_i32_0 = arith.constant 0 : i32
    %c0_i32_1 = arith.constant 0 : i32
    return %arg1, %arg0, %c0_i32, %c0_i32_0 : i32, i32, i32, i32
  }
}

</mosaic_0001>

<bundles_post_ra>
// kernel: tpu_custom_call.1
= control target key start
LH: loop header
LB: loop body
LE: loop exit
PB: predicated region body
PF: predicated region fallthrough
CT: control target
= control target key end

     0   :  { %s1164_s0 = inlined_call_operand.hbm [shape: f32[2,8,32], index: 0, kind: input, shape index: {}]   ;;  %s1165_s1 = inlined_call_operand.hbm [shape: f32[3,32,32], index: 1, kind: input, shape index: {}]   ;;  %s1166_s2 = inlined_call_operand.hbm [shape: f32[3,2,8,32], index: 2, kind: output, shape index: {}]  }
   0x1   :  { %1178 = sst [smem:[#allocation17_spill]] %s1164_s0 }
   0x2   :  { %1179 = sst [smem:[#allocation18_spill]] %s1166_s2 }
   0x3   :  { %7 = vsyncpa [#allocation3], 0 }
   0x4   :  { %9 = vsyncpa [#allocation3 + $0x1], 0 }
   0x5   :  { %10 = vsyncpa [#allocation6], 0 }
   0x6   :  { %12 = vsyncpa [#allocation6 + $0x1], 0 }
   0x7   :  { %13 = vsyncpa [#allocation4], 0 }
   0x8   :  { %15 = vsyncpa [#allocation4 + $0x1], 0  ;;  %s847_s9 = smov 0   ;;  %s849_s10 = smov 0  }
   0x9   :  { %s851_s11 = smov 0   ;;  %s853_s12 = smov 0  }
   0xa   :  { %s855_s13 = smov 0   ;;  %s857_s14 = smov 0  }
   0xb   :  { %s859_s15 = smov 0   ;;  %s861_s16 = smov 0  }
   0xc   :  { %s863_s17 = smov 0   ;;  %s865_s18 = smov 0  }
   0xd   :  { %s867_s19 = smov 0   ;;  %s869_s20 = smov 0  }
   0xe   :  { %s871_s21 = smov 0   ;;  %s873_s22 = smov 0  }
   0xf LB: > { %1180 = sst [smem:[#allocation11_spill]] %s770_s9  ;;  %s434_s23 = sadd.s32 4294967295, %s822_s22   ;;  %s822_s22 = sphi %s873_s22, %s21_s22   ;;  %s818_s21 = sphi %s871_s21, %s1211_s21   ;;  %s814_s20 = sphi %s869_s20, %s1223_s20   ;;  %s810_s19 = sphi %s867_s19, %s1209_s19   ;;  %s806_s18 = sphi %s865_s18, %s1222_s18   ;;  %s802_s17 = sphi %s863_s17, %s1221_s17   ;;  %s798_s16 = sphi %s861_s16, %s1220_s16   ;;  %s794_s15 = sphi %s859_s15, %s1219_s15   ;;  %s790_s14 = sphi %s857_s14, %s1218_s14   ;;  %s786_s13 = sphi %s855_s13, %s1217_s13   ;;  %s782_s12 = sphi %s853_s12, %s1216_s12   ;;  %s778_s11 = sphi %s851_s11, %s1215_s11   ;;  %s774_s10 = sphi %s849_s10, %s1214_s10   ;;  %s770_s9 = sphi %s847_s9, %s1213_s9  }
  0x10   : > { %1181 = sst [smem:[#allocation12_spill]] %s818_s21  ;;  %s40_s24 = sadd.s32 1, %s818_s21 }
  0x11   : > { %1182 = sst [smem:[#allocation13_spill]] %s822_s22  ;;  %p56_p0 = scmp.ne.s32.totalorder %s802_s17, %s798_s16 }
  0x12   : > { %p57_p1 = scmp.eq.s32.totalorder %s822_s22, 0  ;;  %p62_p2 = scmp.ne.s32.totalorder %s798_s16, %s794_s15 }
  0x13   : > { %p63_p3 = scmp.eq.s32.totalorder %s434_s23, 0  ;;  %p84_p4 = scmp.ne.s32.totalorder %s790_s14, %s786_s13 }
  0x14   : > { %p922_p5 = por %p57_p1, %p56_p0  ;;  %p90_p6 = scmp.ne.s32.totalorder %s786_s13, %s782_s12 }
  0x15   : > { %p927_p7 = por %p63_p3, %p62_p2  ;;  %p86_p8 = por %p84_p4, %p57_p1 }
  0x16   : > { %p931_p9 = por %p90_p6, %p63_p3  ;;  %p935_p10 = scmp.eq.s32.totalorder %s434_s23, 5 }
  0x17   : > { %s1184_s27 = scalar_select %p927_p7, 1, 0 }
  0x18   : > { %s1185_s28 = scalar_select %p931_p9, 1, 0 }
  0x19   : > { %p493_p11 = scmp.lt.s32.totalorder %s822_s22, 6  ;;  %s142_s30 = sand.u32 1, %s802_s17  }
  0x1a   : > { %s439_s3 = sshll.u32 %s818_s21, 7  ;;  %s438_s4 = sshll.u32 %s142_s30, 3 }
  0x1b   : > { %s1187_s0 = sld [smem:[#allocation17_spill]]  ;;  %s146_s8 = scalar_lea.vmem [#allocation2], %s438_s4 }
  0x1c   : > { %s154_s12 = sshll.u32 %s146_s8, 4  ;;  %p949_p12 = pnand %p493_p11, %p922_p5  ;;  %s953_s12 = int_to_ptr.vmem [resolvable:$true] %s154_s12 }
  0x1d   : > { %p955_p13 = pnand %p493_p11, %p86_p8 }
  0x1e   : > { %p614_p2 = pneg %p949_p12 }
  0x1f   : > { %s1189_s23 = scalar_select %p955_p13, 1, 0 }
  0x21   : > { %s945_s7 = scalar_lea.hbm %s1187_s0, %s439_s3  ;;  %s143_s3 = scalar_lea.sflag [#allocation3], %s142_s30 }
  0x22   : > { %s612_s5 = scalar_lea.hbm %s945_s7, 128  ;;  %s617_s6 = scalar_lea.hbm %s1187_s0, 256 }
  0x23   : > { %p613_p1 = scmp.ne.s32.totalorder %s945_s7, %s612_s5  ;;  %p618_p5 = scmp.lt.u32.totalorder %s945_s7, %s1187_s0 }
  0x24   : > { %p619_p6 = scmp.lt.u32.totalorder %s617_s6, %s612_s5  ;;  %p621_p11 = scmp.lt.u32.totalorder %s612_s5, %s945_s7 }
  0x25   : > { %p615_p3 = pnand %p614_p2, %p613_p1 }
  0x26   : > { %p620_p8 = por %p619_p6, %p618_p5 }
  0x27   : > { %p616_p4 = pneg %p615_p3 }
  0x28   : > { %p622_p0 = por %p621_p11, %p620_p8 }
  0x2a   : > { %p623_p9 = pnand %p622_p0, %p616_p4 }
  0x2c   : > { %626 = shalt.err (!%p623_p9)
}
  0x2d   : > { %s627_s30 = scalar_lea.vmem %s953_s12, 128  ;;  %s824_s26 = smov [#allocation2]  }
  0x2e   : > { %p628_p1 = scmp.ne.s32.totalorder %s953_s12, %s627_s30  ;;  %s632_s4 = sshll.u32 %s824_s26, 4  ;;  %s633_s4 = int_to_ptr.vmem [resolvable:$false] %s632_s4 }
  0x2f   : > { %s634_s25 = scalar_lea.vmem %s633_s4, 256  ;;  %p635_p13 = scmp.lt.s32.totalorder %s953_s12, %s633_s4 }
  0x30   : > { %p630_p3 = pnand %p628_p1, %p614_p2  ;;  %p636_p5 = scmp.lt.s32.totalorder %s634_s25, %s627_s30 }
  0x32   : > { %p631_p7 = pneg %p630_p3  ;;  %p637_p6 = por %p636_p5, %p635_p13 }
  0x34   : > { %p638_p8 = pnand %p637_p6, %p631_p7 }
  0x36   : > { %641 = shalt.err (!%p638_p8)
}
  0x37   : > { %485 = dma.hbm_to_vmem [thread:$0]  (!%p949_p12), %s945_s7, 128, %s953_s12, %s143_s3  }
  0x38   : > { %p182_p7 = scmp.lt.s32.totalorder %s822_s22, 7  ;;  %p1190_p9 = scmp.ge.s32.totalorder %s822_s22, 1 }
  0x39   : > { %s435_s5 = sadd.s32 4294967294, %s822_s22   ;;  %s36_s6 = sadd.s32 1, %s814_s20 }
  0x3a   : > { %p988_p13 = pnand %p1190_p9, %p182_p7  ;;  %s77_s8 = sadd.s32 1, %s790_s14 }
  0x3b   : > { %p38_p0 = scmp.ge.s32.totalorder %s36_s6, 3  ;;  %s105_s30 = sadd.s32 1, %s778_s11 }
  0x3c   : > { %p115_p2 = scmp.ne.s32.totalorder %s778_s11, %s774_s10  ;;  %p121_p4 = scmp.ne.s32.totalorder %s774_s10, %s770_s9 }
  0x3d   : > { %s1225_s6 = smov (%p38_p0, %s36_s6), 0  ;;  %s1227_s24 = smov (!%p38_p0, %s40_s24), %s818_s21 }
  0x3e   : > { %1192 = sst [smem:[#allocation14_spill]] %s1225_s6  ;;  %s72_s7 = ssub.s32 %s814_s20, %s1225_s6 }
  0x3f   : > { %p1009_p12 = por %p935_p10, %p115_p2  ;;  %p42_p11 = scmp.ge.s32.totalorder %s1227_s24, 2 }
  0x40   : > { %p75_p1 = scmp.eq.s32.totalorder %s72_s7, 0  ;;  %p122_p3 = scmp.eq.s32.totalorder %s435_s5, 5 }
  0x41   : > { %s1193_s12 = scalar_select %p1009_p12, 1, 0 }
  0x42   : > { %s161_s3 = sand.u32 1, %s790_s14   ;;  %s1229_s24 = smov (%p42_p11, %s1227_s24), 0 }
  0x43   : > { %1194 = sst [smem:[#allocation15_spill]] %s1229_s24  ;;  %s44_s4 = ssub.s32 %s818_s21, %s1229_s24 }
  0x44   : > { %s1017_s26 = scalar_select %p75_p1, %s790_s14, %s77_s8  }
  0x45   : > { %p1021_p5 = por %p122_p3, %p121_p4  ;;  %p47_p10 = scmp.eq.s32.totalorder %s44_s4, 0 }
  0x46   : > { %1195 = sst [smem:[#allocation16_spill]] %s1017_s26  ;;  %s102_s29 = sor.u32 %s72_s7, %s44_s4 }
  0x47   : > { %s1196_s25 = scalar_select %p1021_p5, 1, 0 }
  0x48   : > { %p103_p6 = scmp.eq.s32.totalorder %s102_s29, 0  ;;  %s1197_s0 = sadd.s32 1, %s802_s17 }
  0x49   : > { %s1028_s6 = scalar_select %p47_p10, %s802_s17, %s1197_s0  }
  0x4a   : > { %s1031_s5 = scalar_select %p103_p6, %s778_s11, %s105_s30  }
  0x4b   : > { %s440_s9 = sshll.u32 %s161_s3, 5  ;;  %s453_s22 = sshll.u32 %s814_s20, 9 }
  0x4c   : > { %s1037_s24 = scalar_lea.hbm %s1165_s1, %s453_s22  ;;  %s165_s21 = scalar_lea.vmem [#allocation5], %s440_s9 }
  0x4d   : > { %s174_s26 = sshll.u32 %s165_s21, 4  ;;  %s1041_s7 = scalar_lea.sflag [#allocation6], %s161_s3  ;;  %s1039_s26 = int_to_ptr.vmem [resolvable:$true] %s174_s26 }
  0x4e   : > { %s642_s0 = scalar_lea.hbm %s1037_s24, 512  ;;  %p1198_p7 = scmp.ne.s32.totalorder %s1189_s23, 0 }
  0x4f   : > { %p643_p8 = scmp.ne.s32.totalorder %s1037_s24, %s642_s0  ;;  %s647_s30 = scalar_lea.hbm %s1165_s1, 1536 }
  0x50   : > { %p644_p9 = pneg %p1198_p7  ;;  %p648_p4 = scmp.lt.u32.totalorder %s1037_s24, %s1165_s1 }
  0x51   : > { %p649_p11 = scmp.lt.u32.totalorder %s647_s30, %s642_s0  ;;  %p651_p3 = scmp.lt.u32.totalorder %s642_s0, %s1037_s24 }
  0x52   : > { %p645_p0 = pnand %p644_p9, %p643_p8 }
  0x53   : > { %p650_p1 = por %p649_p11, %p648_p4 }
  0x54   : > { %p646_p2 = pneg %p645_p0 }
  0x55   : > { %p652_p10 = por %p651_p3, %p650_p1 }
  0x57   : > { %p653_p6 = pnand %p652_p10, %p646_p2 }
  0x59   : > { %656 = shalt.err (!%p653_p6)
}
  0x5a   : > { %s657_s9 = scalar_lea.vmem %s1039_s26, 512  ;;  %s825_s21 = smov [#allocation5]  }
  0x5b   : > { %p658_p8 = scmp.ne.s32.totalorder %s1039_s26, %s657_s9  ;;  %s662_s3 = sshll.u32 %s825_s21, 4  ;;  %s663_s3 = int_to_ptr.vmem [resolvable:$false] %s662_s3 }
  0x5c   : > { %s664_s8 = scalar_lea.vmem %s663_s3, 1024  ;;  %p665_p12 = scmp.lt.s32.totalorder %s1039_s26, %s663_s3 }
  0x5d   : > { %p660_p0 = pnand %p658_p8, %p644_p9  ;;  %p666_p4 = scmp.lt.s32.totalorder %s664_s8, %s657_s9 }
  0x5f   : > { %p661_p5 = pneg %p660_p0  ;;  %p667_p11 = por %p666_p4, %p665_p12 }
  0x61   : > { %p668_p1 = pnand %p667_p11, %p661_p5 }
  0x63   : > { %671 = shalt.err (!%p668_p1)
}
  0x64   : > { %s826_s0 = smov 128   ;;  %s827_s2 = smov 8  }
  0x65   : > { %488 = dma.hbm_to_vmem [thread:$0]  (!%p1198_p7), %s1037_s24, 512, %s1039_s26, %s1041_s7, %s826_s0, %s826_s0, %s827_s2  }
  0x66   : > { %186 = sbr.rel (%p988_p13) target bundleno = 350 (0x15e), region = 28  ;;  %s188_s22 = sand.u32 (!%p988_p13), 1, %s798_s16  }
  0x67   : > { %s444_s30 = sshll.u32 (!%p988_p13), %s188_s22, 3  ;;  %s189_s4 = scalar_lea.sflag (!%p988_p13), [#allocation3], %s188_s22 }
  0x68   : > { %s192_s29 = scalar_lea.vmem (!%p988_p13), [#allocation2], %s444_s30  ;;  %p1199_p12 = scmp.ne.s32.totalorder (!%p988_p13), %s1184_s27, 0 }
  0x6d   : > { %757 = dma.done.wait (%p1199_p12), %s189_s4, 128  }
  0x6e   : > { %759 = vsyncadd (%p1199_p12), %s189_s4, 4294967168  ;;  %s197_s9 = sand.u32 1, %s786_s13   ;;  %p1200_p5 = scmp.ne.s32.totalorder %s1185_s28, 0 }
  0x6f   : > { %s445_s21 = sshll.u32 %s197_s9, 5  ;;  %s198_s23 = scalar_lea.sflag [#allocation6], %s197_s9 }
  0x70   : > { %s201_s24 = scalar_lea.vmem [#allocation5], %s445_s21 }
  0x71   : > { %761 = dma.done.wait (%p1200_p5), %s198_s23, 512  }
  0x72   : > { %763 = vsyncadd (%p1200_p5), %s198_s23, 4294966784  ;;  %v828_v0 = vmov 0.0|0.0   ;;  %vm829_vm0 = vmmov 0   ;;  %v830_v1 = vmov 0.0   ;;  %v229_v2 = vld [vmem:[%s201_s24] sm:$0xff]  ;;  %v230_v3 = vld [vmem:[%s201_s24 + $0x8] sm:$0xff] }
  0x73   : > { %470 = vmatprep.subr.bf16.mxu0 %v828_v0  ;;  %467 = vmatprep.mubr.msk.f32.mxu0 %vm829_vm0, %v830_v1  ;;  %v231_v4 = vld [vmem:[%s201_s24 + $0x10] sm:$0xff]  ;;  %v471_v5 = vpack.c.bf16 %v230_v3, %v229_v2  ;;  %v232_v6 = vld [vmem:[%s201_s24 + $0x18] sm:$0xff]  ;;  %vm233_vm1 = vcmask 261120   ;;  %s224_s27 = sand.u32 1, %s774_s10   ;;  %s449_s15 = sshll.u32 %s806_s18, 1 }
  0x74   : > { %v474_v7 = vpack.c.bf16 %v232_v6, %v231_v4  ;;  %v228_v8 = vld [vmem:[%s192_s29] sm:$0xff]  ;;  %s446_s28 = sshll.u32 %s224_s27, 3  ;;  %s320_s26 = sadd.s32 %s810_s19, %s449_s15 }
  0x75   : > { %472 = vmatpush3.bf16.msra.mxu0 %v471_v5  ;;  %s450_s7 = sshll.u32 %s320_s26, 7  ;;  %s226_s3 = scalar_lea.vmem [#allocation7], %s446_s28 }
  0x76   : > { %473 = vmatprep.subr.bf16.mxu0 %v828_v0  ;;  %s324_s8 = sshll.u32 %s226_s3, 4  ;;  %s1201_s22 = sld [smem:[#allocation18_spill]]  ;;  %s1089_s8 = int_to_ptr.vmem [resolvable:$true] %s324_s8 }
  0x77   : > { %s309_s29 = scalar_lea.sflag [#allocation4], %s224_s27  ;;  %s672_s9 = scalar_lea.vmem %s1089_s8, 128 }
  0x78   : > { %p673_p13 = scmp.ne.s32.totalorder %s1089_s8, %s672_s9  ;;  %p1203_p7 = scmp.ne.s32.totalorder %s1193_s12, 0 }
  0x79   : > { %475 = vmatpush3.bf16.msra.mxu0 %v474_v7  ;;  %s831_s18 = smov [#allocation7]  }
  0x7a   : > { %p674_p9 = pnand %p673_p13, %p1203_p7  ;;  %s676_s19 = sshll.u32 %s831_s18, 4  ;;  %s677_s19 = int_to_ptr.vmem [resolvable:$false] %s676_s19 }
  0x7b   : > { %s678_s21 = scalar_lea.vmem %s677_s19, 256  ;;  %p679_p3 = scmp.lt.s32.totalorder %s1089_s8, %s677_s19 }
  0x7c   : > { %468 = vmatmul.mubr.msk.f32.vlgmr.msra.gmra.mrb[0].mxu0 %vm233_vm1, %v228_v8  ;;  %s1202_s30 = smov %s1201_s22  ;;  %s1087_s4 = scalar_lea.hbm %s1201_s22, %s450_s7 }
  0x7d   : > { %p675_p2 = pneg %p674_p9  ;;  %p680_p10 = scmp.lt.s32.totalorder %s678_s21, %s672_s9 }
  0x7f   : > { %p681_p6 = por %p680_p10, %p679_p3 }
  0x81   : > { %p682_p8 = pnand %p681_p6, %p675_p2 }
 0x14f   : > { %v303_v9 = vpop.f32.mrb[0].mxu0 }
 0x150   : > { %307 = vst.msk [vmem:[%s226_s3] sm:$0xff] %vm233_vm1, %v303_v9  ;;  %v469_v10 = vpop.f32.mrb[1].mxu0 }
 0x151   : > { %685 = shalt.err (!%p682_p8)
}
 0x152   : > { %s686_s23 = scalar_lea.hbm %s1087_s4, 128  ;;  %s690_s28 = scalar_lea.hbm %s1202_s30, 768 }
 0x153   : > { %p687_p0 = scmp.ne.s32.totalorder %s1087_s4, %s686_s23  ;;  %p691_p1 = scmp.lt.u32.totalorder %s1087_s4, %s1202_s30 }
 0x154   : > { %p692_p12 = scmp.lt.u32.totalorder %s690_s28, %s686_s23  ;;  %p694_p13 = scmp.lt.u32.totalorder %s686_s23, %s1087_s4 }
 0x155   : > { %p688_p4 = pnand %p687_p0, %p1203_p7 }
 0x156   : > { %p693_p5 = por %p692_p12, %p691_p1 }
 0x157   : > { %p689_p11 = pneg %p688_p4 }
 0x158   : > { %p695_p9 = por %p694_p13, %p693_p5 }
 0x15a   : > { %p696_p2 = pnand %p695_p9, %p689_p11 }
 0x15c   : > { %699 = shalt.err (!%p696_p2)
}
 0x15d   : > { %480 = dma.vmem_to_hbm [thread:$0]  (%p1203_p7), %s1089_s8, 128, %s1087_s4, %s309_s29  }
 0x15e PF: > { %s1204_s7 = sld [smem:[#allocation13_spill]]  ;;  %s1205_s3 = sld [smem:[#allocation11_spill]] }
 0x15f   : > { %p1206_p10 = scmp.ne.s32.totalorder %s1196_s25, 0 }
 0x164   : > { %p494_p3 = scmp.ge.s32.totalorder %s1204_s7, 2  ;;  %s336_s0 = sand.u32 1, %s1205_s3  }
 0x165   : > { %s337_s2 = scalar_lea.sflag [#allocation4], %s336_s0 }
 0x166   : > { %p490_p6 = pnand %p494_p3, %p1206_p10 }
 0x168   : > { %765 = dma.done.wait (!%p490_p6), %s337_s2, 128  }
 0x169   : > { %767 = vsyncadd (!%p490_p6), %s337_s2, 4294967168  ;;  %s21_s22 = sadd.s32 1, %s1204_s7   ;;  %s1208_s8 = sld [smem:[#allocation16_spill]] }
 0x16a   : > { %p1117_p8 = scmp.ge.s32.totalorder %s21_s22, 8   ;;  %s1209_s19 = sld [smem:[#allocation12_spill]] }
 0x16b   : > { %s1210_s25 = sld [smem:[#allocation14_spill]]  ;;  %s1211_s21 = sld [smem:[#allocation15_spill]] }
 0x16c   : > { %s1213_s9 = smov %s774_s10  ;;  %s1214_s10 = smov %s778_s11 }
 0x16d   : > { %s1215_s11 = smov %s1031_s5  ;;  %s1216_s12 = smov %s786_s13 }
 0x16e   : > { %s1217_s13 = smov %s790_s14  ;;  %s1219_s15 = smov %s798_s16 }
 0x16f   : > { %s1218_s14 = smov %s1208_s8  ;;  %s1220_s16 = smov %s802_s17 }
 0x170   : > { %s1221_s17 = smov %s1028_s6  ;;  %s1222_s18 = smov %s814_s20 }
 0x171   : > { %s1223_s20 = smov %s1210_s25  ;;  %20 = sbr.rel (!%p1117_p8) target bundleno = 15 (0xf), region = 86 }
 0x178   :  { %342 = vsyncpa [#allocation3], 1 }
 0x179   :  { %344 = vsyncpa [#allocation3 + $0x1], 1 }
 0x17a   :  { %345 = vsyncpa [#allocation6], 1 }
 0x17b   :  { %347 = vsyncpa [#allocation6 + $0x1], 1 }
 0x17c   :  { %348 = vsyncpa [#allocation4], 1 }
 0x17d   :  { %350 = vsyncpa [#allocation4 + $0x1], 1 }

</bundles_post_ra>
